<compile_context>
chip_gen: v7x
topology: tpu7x:2x2x1
jax: 0.10.0
libtpu: 0.0.40
codegen_flags: <defaults>
</compile_context>

<pallas_src>
import functools
import math
import random

import jax
import jax.numpy as jnp
from jax.experimental import pallas as pl
from jax.experimental.pallas import tpu as pltpu


_LANE = 128

# ----------------------------- Pallas kernels ------------------------------
#
# All kernels are per-(batch, pixel-row-tile, channel) element-wise VPU work:
#   shadow    = clip(sns, 0, 1)                      (spatial, pre-scaled)
#   cloud     = clip(cn * cls + clo, 0, 1)           (per-channel mask)
#   cloudbase = cbo + cbs * cloud                    (channel_magnitude*cloud_hue)
#   out       = img*(1-shadow)*(1-cloud) + cloudbase*cloud   (max_lvl == 1)


def _make_cloud_shadow_kernel(with_masks):
    def kernel(img_ref, sns_ref, cn_ref, cls_ref, clo_ref, cbs_ref, cbo_ref,
               out_ref, *mask_refs):
        img = img_ref[...].astype(jnp.float32)                       # (1,1,TR,128)
        sh = jnp.clip(sns_ref[...].astype(jnp.float32), 0.0, 1.0)    # (1,1,TR,128)
        cl = jnp.clip(cn_ref[...].astype(jnp.float32) * cls_ref[...] + clo_ref[...],
                      0.0, 1.0)                                       # (1,1,TR,128)
        cbase = cbo_ref[...] + cbs_ref[...] * cl
        out_ref[...] = (img * (1.0 - sh) * (1.0 - cl) + cbase * cl).astype(out_ref.dtype)
        if with_masks:
            cloud_ref, shadow_ref = mask_refs
            cloud_ref[...] = cl.astype(cloud_ref.dtype)
            shadow_ref[...] = sh.astype(shadow_ref.dtype)
    return kernel


def _make_cloud_kernel(with_mask):
    def kernel(img_ref, cn_ref, cls_ref, clo_ref, cbs_ref, cbo_ref,
               out_ref, *mask_refs):
        img = img_ref[...].astype(jnp.float32)
        cl = jnp.clip(cn_ref[...].astype(jnp.float32) * cls_ref[...] + clo_ref[...],
                      0.0, 1.0)
        cbase = cbo_ref[...] + cbs_ref[...] * cl
        out_ref[...] = (img * (1.0 - cl) + cbase * cl).astype(out_ref.dtype)
        if with_mask:
            mask_refs[0][...] = cl.astype(mask_refs[0].dtype)
    return kernel


def _make_invert_kernel(with_mask):
    def kernel(img_ref, cn_ref, cls_ref, clo_ref, out_ref, *mask_refs):
        img = img_ref[...].astype(jnp.float32)
        cl = jnp.clip(cn_ref[...].astype(jnp.float32) * cls_ref[...] + clo_ref[...],
                      0.0, 1.0)
        out_ref[...] = (img * (1.0 - cl)).astype(out_ref.dtype)
        if with_mask:
            mask_refs[0][...] = cl.astype(mask_refs[0].dtype)
    return kernel


# --------------------------- pallas_call wrappers ---------------------------

_COMPILER_PARAMS = pltpu.CompilerParams(
    dimension_semantics=("parallel", "parallel", "arbitrary"),
    vmem_limit_bytes=32 * 1024 * 1024)

_BIG_BLOCK_BUDGET = 8 * 1024 * 1024      # bytes of "big" blocks per pipeline copy


def _row_tiling(P, n_big):
    """Pick (padded_rows, rows_per_tile) for the pixel axis folded as
    (rows, 128) lanes.  Rows per tile are a multiple of 8 (dense sublanes) and
    sized so that n_big double-buffered blocks stay well inside VMEM."""
    r_raw = (P + _LANE - 1) // _LANE
    r8 = ((r_raw + 7) // 8) * 8
    cap = _BIG_BLOCK_BUDGET // (4 * _LANE * max(1, n_big))
    cap = max(8, min(8192, (cap // 8) * 8))
    if r8 <= cap:
        return r8, r8
    # Largest multiple-of-8 divisor of r8 that fits the budget (no extra pad).
    best, t = 8, 8
    while t <= cap:
        if r8 % t == 0:
            best = t
        t += 8
    if best * 4 >= cap:
        return r8, best
    # Otherwise accept a little extra row padding to keep tiles big.
    rp = ((r8 + cap - 1) // cap) * cap
    return rp, cap


def _fold_pixels(x_bcp, rp):
    """(B, C, P) -> zero-padded (B, C, rp, 128)."""
    B, C, P = x_bcp.shape
    pp = rp * _LANE
    if pp > P:
        x_bcp = jnp.pad(x_bcp, ((0, 0), (0, 0), (0, pp - P)))
    return x_bcp.reshape(B, C, rp, _LANE)


def _unfold_pixels(x4, P):
    B, C, rp, lane = x4.shape
    return x4.reshape(B, C, rp * lane)[:, :, :P]


def _specs(tr):
    img = pl.BlockSpec((1, 1, tr, _LANE), lambda b, r, c: (b, c, r, 0))
    noise = pl.BlockSpec((1, 1, tr, _LANE), lambda b, r, c: (b, 0, r, 0))
    param = pl.BlockSpec((1, 1, 1, 1), lambda b, r, c: (b, c, 0, 0))
    return img, noise, param


def _as_tuple(res):
    return res if isinstance(res, (tuple, list)) else (res,)


def _run_cloud_shadow(img_bcp, sns_bp, cn_bp, cls, clo, cbs, cbo, return_cloud):
    B, C, P = img_bcp.shape
    n_big = 6 if return_cloud else 4          # img, sns, cn, out (+cloud, shadow)
    rp, tr = _row_tiling(P, n_big)
    img4 = _fold_pixels(img_bcp, rp)
    sns4 = _fold_pixels(sns_bp.reshape(B, 1, P).astype(jnp.float32), rp)
    cn4 = _fold_pixels(cn_bp.reshape(B, 1, P).astype(jnp.float32), rp)
    img_s, noise_s, param_s = _specs(tr)
    out_shape = [jax.ShapeDtypeStruct((B, C, rp, _LANE), img_bcp.dtype)]
    out_specs = [img_s]
    if return_cloud:
        out_shape += [jax.ShapeDtypeStruct((B, C, rp, _LANE), img_bcp.dtype),
                      jax.ShapeDtypeStruct((B, 1, rp, _LANE), img_bcp.dtype)]
        out_specs += [img_s, noise_s]
    res = _as_tuple(pl.pallas_call(
        _make_cloud_shadow_kernel(return_cloud),
        out_shape=tuple(out_shape),
        grid=(B, rp // tr, C),
        in_specs=[img_s, noise_s, noise_s, param_s, param_s, param_s, param_s],
        out_specs=tuple(out_specs),
        compiler_params=_COMPILER_PARAMS,
    )(img4, sns4, cn4, cls, clo, cbs, cbo))
    out = _unfold_pixels(res[0], P)
    if not return_cloud:
        return (out,)
    return out, _unfold_pixels(res[1], P), _unfold_pixels(res[2], P)


def _run_cloud(img_bcp, cn_bp, cls, clo, cbs, cbo, return_cloud):
    B, C, P = img_bcp.shape
    n_big = 4 if return_cloud else 3
    rp, tr = _row_tiling(P, n_big)
    img4 = _fold_pixels(img_bcp, rp)
    cn4 = _fold_pixels(cn_bp.reshape(B, 1, P).astype(jnp.float32), rp)
    img_s, noise_s, param_s = _specs(tr)
    out_shape = [jax.ShapeDtypeStruct((B, C, rp, _LANE), img_bcp.dtype)]
    out_specs = [img_s]
    if return_cloud:
        out_shape += [jax.ShapeDtypeStruct((B, C, rp, _LANE), img_bcp.dtype)]
        out_specs += [img_s]
    res = _as_tuple(pl.pallas_call(
        _make_cloud_kernel(return_cloud),
        out_shape=tuple(out_shape),
        grid=(B, rp // tr, C),
        in_specs=[img_s, noise_s, param_s, param_s, param_s, param_s],
        out_specs=tuple(out_specs),
        compiler_params=_COMPILER_PARAMS,
    )(img4, cn4, cls, clo, cbs, cbo))
    out = _unfold_pixels(res[0], P)
    if not return_cloud:
        return (out,)
    return out, _unfold_pixels(res[1], P)


def _run_invert(img_bcp, cn_bp, cls, clo, return_cloud):
    B, C, P = img_bcp.shape
    n_big = 4 if return_cloud else 3
    rp, tr = _row_tiling(P, n_big)
    img4 = _fold_pixels(img_bcp, rp)
    cn4 = _fold_pixels(cn_bp.reshape(B, 1, P).astype(jnp.float32), rp)
    img_s, noise_s, param_s = _specs(tr)
    out_shape = [jax.ShapeDtypeStruct((B, C, rp, _LANE), img_bcp.dtype)]
    out_specs = [img_s]
    if return_cloud:
        out_shape += [jax.ShapeDtypeStruct((B, C, rp, _LANE), img_bcp.dtype)]
        out_specs += [img_s]
    res = _as_tuple(pl.pallas_call(
        _make_invert_kernel(return_cloud),
        out_shape=tuple(out_shape),
        grid=(B, rp // tr, C),
        in_specs=[img_s, noise_s, param_s, param_s],
        out_specs=tuple(out_specs),
        compiler_params=_COMPILER_PARAMS,
    )(img4, cn4, cls, clo))
    out = _unfold_pixels(res[0], P)
    if not return_cloud:
        return (out,)
    return out, _unfold_pixels(res[1], P)


# ------------------------------ JAX glue -----------------------------------

def _fade(t):
    return 6.0 * t ** 5 - 15.0 * t ** 4 + 10.0 * t ** 3


def _perlin_2d(key, h, w, res):
    """Single-octave Perlin noise, gather-free (block-constant gradient
    expansion via jnp.repeat instead of per-pixel gathers)."""
    ry, rx = res
    dy, dx = h // ry, w // rx
    angles = 2.0 * jnp.pi * jax.random.uniform(key, (ry + 1, rx + 1), jnp.float32)
    g0 = jnp.cos(angles)                      # multiplies the y displacement
    g1 = jnp.sin(angles)                      # multiplies the x displacement
    fy = (jnp.arange(h) % dy).astype(jnp.float32) / dy
    fx = (jnp.arange(w) % dx).astype(jnp.float32) / dx
    FY, FX = fy[:, None], fx[None, :]
    ty, tx = _fade(fy)[:, None], _fade(fx)[None, :]

    def expand(g):                            # (ry, rx) -> (h, w), no gather
        return jnp.repeat(jnp.repeat(g, dy, axis=0), dx, axis=1)

    def corner(oy, ox):
        gy = expand(g0[oy:oy + ry, ox:ox + rx])
        gx = expand(g1[oy:oy + ry, ox:ox + rx])
        return gy * (FY - oy) + gx * (FX - ox)

    n00, n01 = corner(0, 0), corner(0, 1)
    n10, n11 = corner(1, 0), corner(1, 1)
    nx0 = n00 + tx * (n01 - n00)
    nx1 = n10 + tx * (n11 - n10)
    return math.sqrt(2.0) * (nx0 + ty * (nx1 - nx0))


def generate_perlin(key, shape, batch, const_scale=True, decay_factor=1.0):
    # TODO(synk): approximation of the upstream fractal Perlin generator
    # (const_scale is a no-op at fixed resolution); decay_factor shapes the
    # amplitude spectrum.  Batch is vmapped (no per-sample Python loops).
    h, w = shape
    n_oct = max(1, int(math.log2(max(2, min(h, w)))) - 1)
    acc = jnp.zeros((batch, h, w), jnp.float32)
    for o in range(n_oct):
        res = 2 ** (o + 1)
        if h % res or w % res or res > min(h, w):
            break
        okey = jax.random.fold_in(key, o)
        bkeys = jax.random.split(okey, batch)
        octave = jax.vmap(lambda k: _perlin_2d(k, h, w, (res, res)))(bkeys)
        amp = (0.5 ** o) ** decay_factor
        acc = acc + amp * octave
    return acc


def _sample_levels(k_min, k_max, B, min_lvl, max_lvl):
    if isinstance(min_lvl, (tuple, list)):
        mn = min_lvl[0] + (min_lvl[1] - min_lvl[0]) * jax.random.uniform(
            k_min, (B,), jnp.float32)
    else:
        mn = jnp.full((B,), float(min_lvl), jnp.float32)
    if isinstance(max_lvl, (tuple, list)):
        max_floor = mn + jnp.maximum(max_lvl[0] - mn, 0.0)
        mx = max_floor + (max_lvl[1] - max_floor) * jax.random.uniform(
            k_max, (B,), jnp.float32)
    else:
        mx = jnp.full((B,), float(max_lvl), jnp.float32)
    mx = mn + jnp.maximum(mx - mn, 0.0)
    return mn, mx


def _channel_weights(key, C, shift):
    if shift != 0.0:
        s = abs(float(shift))
        return s * (2.0 * jax.random.uniform(key, (C,), jnp.float32) - 1.0) + 1.0
    return jnp.ones((C,), jnp.float32)


def _make_noise_mask(key, B, H, W, clear_threshold, decay_factor,
                     locality_degree, const_scale):
    """Normalised cloud-shape noise (B,H,W): fractal Perlin, global (over the
    whole tensor, as in the torch reference) min/max normalisation, locality
    product, clear-threshold cut and renormalisation."""
    locality_degree = max(1, int(locality_degree))
    if isinstance(clear_threshold, (tuple, list)):
        key, k_ct = jax.random.split(key)
        ct = clear_threshold[0] + (clear_threshold[1] - clear_threshold[0]) * \
            jax.random.uniform(k_ct, (B, 1, 1), jnp.float32)
    else:
        ct = float(clear_threshold)
    if isinstance(decay_factor, (tuple, list)):
        key, k_df = jax.random.split(key)
        decay_factor = decay_factor[0] + (decay_factor[1] - decay_factor[0]) * \
            jax.random.uniform(k_df, (), jnp.float32)
    net = jnp.ones((B, H, W), jnp.float32)
    for idx in range(locality_degree):
        k_i = jax.random.fold_in(key, idx)
        ns = generate_perlin(k_i, (H, W), B, const_scale=const_scale,
                             decay_factor=decay_factor)
        ns = ns - jnp.min(ns)
        ns = ns / jnp.max(ns)
        net = net * ns
    net = jnp.where(net < ct, 0.0, net)
    net = jnp.clip(net - ct, 0.0, 1.0)
    m = jnp.max(net)
    net = net / jnp.where(m == 0.0, 1.0, m)
    return net


def _color_vector(mean_color):
    """cloud_hue() colour vector from per-(b,c) mean colour."""
    has_zero = jnp.any(mean_color == 0.0, axis=1, keepdims=True)
    mean_color = jnp.where(has_zero, jnp.ones_like(mean_color), mean_color)
    cvec = mean_color / jnp.mean(mean_color, axis=1, keepdims=True)
    cvec = cvec / jnp.max(cvec, axis=1, keepdims=True)
    return cvec


def _as_hashable(v):
    return tuple(v) if isinstance(v, list) else v


# ------------------------------ add_cloud ----------------------------------

_ADD_CLOUD_STATICS = ("max_lvl", "min_lvl", "clear_threshold", "const_scale",
                      "decay_factor", "locality_degree", "invert",
                      "channel_magnitude_shift", "channel_offset",
                      "blur_scaling", "cloud_color", "return_cloud")


@functools.partial(jax.jit, static_argnames=_ADD_CLOUD_STATICS)
def _add_cloud_impl(key, img, channel_magnitude, *, max_lvl, min_lvl,
                    clear_threshold, const_scale, decay_factor, locality_degree,
                    invert, channel_magnitude_shift, channel_offset,
                    blur_scaling, cloud_color, return_cloud):
    B, C, H, W = img.shape
    P = H * W
    if channel_offset != 0:
        # TODO(synk): per-channel roll + kornia-style bilinear resize path.
        raise NotImplementedError("channel_offset != 0 is not implemented")
    if not isinstance(locality_degree, int):
        # TODO(synk): list/tuple locality_degree sampling is not implemented.
        raise NotImplementedError("list-valued locality_degree is not implemented")
    # TODO(synk): blur_scaling (local_gaussian_blur) source is not part of the
    # provided reference; the locally varying blur is not applied.

    k_min, k_max, k_w, k_noise = jax.random.split(key, 4)
    mn, mx = _sample_levels(k_min, k_max, B, min_lvl, max_lvl)
    cn = _make_noise_mask(k_noise, B, H, W, clear_threshold, decay_factor,
                          locality_degree, const_scale)
    weights = _channel_weights(k_w, C, channel_magnitude_shift)

    cls = (weights[None, :] * (mx - mn)[:, None]).reshape(B, C, 1, 1)
    clo = (weights[None, :] * mn[:, None]).reshape(B, C, 1, 1)
    img_bcp = img.reshape(B, C, P)
    cn_bp = cn.reshape(B, P)

    if channel_magnitude is None:
        mag = jnp.ones((B, C), jnp.float32)
    else:
        mag = jnp.reshape(channel_magnitude, (B, C)).astype(jnp.float32)

    if invert:
        res = _run_invert(img_bcp, cn_bp, cls, clo, return_cloud)
    else:
        # mix(): max_lvl = cloud.max() only if > 1.0; the mask is clipped to
        # [0, 1] before mix(), so max_lvl == 1.0 exactly.
        if cloud_color:
            mean_color = jnp.mean(img_bcp.astype(jnp.float32), axis=-1)   # (B,C)
            cvec = _color_vector(mean_color)
            cbo = (mag * cvec).reshape(B, C, 1, 1)
            cbs = (mag * (1.0 - cvec)).reshape(B, C, 1, 1)
        else:
            cbo = mag.reshape(B, C, 1, 1)
            cbs = jnp.zeros((B, C, 1, 1), jnp.float32)
        res = _run_cloud(img_bcp, cn_bp, cls, clo, cbs, cbo, return_cloud)

    out = res[0].reshape(B, C, H, W)
    if return_cloud:
        cloud = res[1].reshape(B, C, H, W)
        return out, cloud
    return out


def add_cloud_pallas(key, img, max_lvl=(0.95, 1.0), min_lvl=(0.0, 0.05),
                     channel_magnitude=None, clear_threshold=0.0,
                     noise_type="perlin", const_scale=True, decay_factor=1,
                     locality_degree=1, invert=False,
                     channel_magnitude_shift=0.05, channel_offset=0,
                     blur_scaling=0.0, cloud_color=True, return_cloud=False):
    assert noise_type == "perlin", "only 'perlin' noise_type is supported"
    return _add_cloud_impl(
        key, img, channel_magnitude,
        max_lvl=_as_hashable(max_lvl), min_lvl=_as_hashable(min_lvl),
        clear_threshold=_as_hashable(clear_threshold),
        const_scale=bool(const_scale), decay_factor=_as_hashable(decay_factor),
        locality_degree=_as_hashable(locality_degree), invert=bool(invert),
        channel_magnitude_shift=float(channel_magnitude_shift),
        channel_offset=int(channel_offset), blur_scaling=float(blur_scaling),
        cloud_color=bool(cloud_color), return_cloud=bool(return_cloud))


# ------------------------- add_cloud_and_shadow -----------------------------

_ADD_CS_STATICS = ("max_lvl", "min_lvl", "shadow_max_lvl", "clear_threshold",
                   "const_scale", "decay_factor", "locality_degree",
                   "channel_offset", "channel_magnitude_shift", "blur_scaling",
                   "cloud_color", "return_cloud")


@functools.partial(jax.jit, static_argnames=_ADD_CS_STATICS)
def _add_cloud_and_shadow_impl(key, img, channel_magnitude, *, max_lvl, min_lvl,
                               shadow_max_lvl, clear_threshold, const_scale,
                               decay_factor, locality_degree, channel_offset,
                               channel_magnitude_shift, blur_scaling,
                               cloud_color, return_cloud):
    B, C, H, W = img.shape
    P = H * W
    if channel_offset != 0:
        raise NotImplementedError("channel_offset != 0 is not implemented")
    if not isinstance(locality_degree, int):
        raise NotImplementedError("list-valued locality_degree is not implemented")
    shadow_locality = max(1, locality_degree - 1)
    if isinstance(min_lvl, (list, tuple)):
        if min_lvl[0] > 0.0:
            shadow_max_lvl = 0.0
    elif min_lvl > 0.0:
        shadow_max_lvl = 0.0

    k_shadow, k_cloud = jax.random.split(key)

    # --- shadow branch: add_cloud(..., min_lvl=0.0, clear_threshold=0.4,
    #                              decay_factor=1.5, cm_shift=0, invert=True) ---
    ks_min, ks_max, ks_noise = jax.random.split(k_shadow, 3)
    smn, smx = _sample_levels(ks_min, ks_max, B, 0.0, shadow_max_lvl)
    sn = _make_noise_mask(ks_noise, B, H, W, 0.4, 1.5, shadow_locality,
                          const_scale)
    sns_bp = (sn * (smx - smn)[:, None, None] + smn[:, None, None]).reshape(B, P)

    # --- cloud branch parameters ---
    kc_min, kc_max, kc_w, kc_noise = jax.random.split(k_cloud, 4)
    cmn, cmx = _sample_levels(kc_min, kc_max, B, min_lvl, max_lvl)
    cn = _make_noise_mask(kc_noise, B, H, W, clear_threshold, decay_factor,
                          locality_degree, const_scale)
    weights = _channel_weights(kc_w, C, channel_magnitude_shift)
    cls = (weights[None, :] * (cmx - cmn)[:, None]).reshape(B, C, 1, 1)
    clo = (weights[None, :] * cmn[:, None]).reshape(B, C, 1, 1)

    if channel_magnitude is None:
        mag = jnp.ones((B, C), jnp.float32)
    else:
        mag = jnp.reshape(channel_magnitude, (B, C)).astype(jnp.float32)

    img_bcp = img.reshape(B, C, P)
    cn_bp = cn.reshape(B, P)

    if cloud_color:
        # cloud_hue() mean colour of the shadow-darkened image (mix's input):
        # mean(img*(1-sh)) = mean(img) - <img, sh>/P  (no (B,C,P) temp in HBM).
        sh_flat = jnp.clip(sns_bp, 0.0, 1.0)                               # (B,P)
        img_f = img_bcp.astype(jnp.float32)
        mean_img = jnp.mean(img_f, axis=-1)                                # (B,C)
        mean_img_sh = jnp.einsum(
            "bcp,bp->bc", img_f, sh_flat,
            precision=jax.lax.Precision.HIGHEST,
            preferred_element_type=jnp.float32) / float(P)
        mean_color = mean_img - mean_img_sh
        cvec = _color_vector(mean_color)
        cbo = (mag * cvec).reshape(B, C, 1, 1)
        cbs = (mag * (1.0 - cvec)).reshape(B, C, 1, 1)
    else:
        cbo = mag.reshape(B, C, 1, 1)
        cbs = jnp.zeros((B, C, 1, 1), jnp.float32)

    res = _run_cloud_shadow(img_bcp, sns_bp, cn_bp, cls, clo, cbs, cbo,
                            return_cloud)
    out = res[0].reshape(B, C, H, W)
    if return_cloud:
        cloud = res[1].reshape(B, C, H, W)
        shadow = jnp.broadcast_to(res[2].reshape(B, 1, H, W), (B, C, H, W))
        return out, cloud, shadow
    return out


def add_cloud_and_shadow_pallas(key, img, max_lvl=(0.95, 1.0),
                                min_lvl=(0.0, 0.05), channel_magnitude=None,
                                shadow_max_lvl=(0.3, 0.6), clear_threshold=0.0,
                                noise_type="perlin", const_scale=True,
                                decay_factor=1, locality_degree=1,
                                channel_offset=0, channel_magnitude_shift=0.05,
                                blur_scaling=0.0, cloud_color=True,
                                return_cloud=False):
    assert noise_type == "perlin", "only 'perlin' noise_type is supported"
    return _add_cloud_and_shadow_impl(
        key, img, channel_magnitude,
        max_lvl=_as_hashable(max_lvl), min_lvl=_as_hashable(min_lvl),
        shadow_max_lvl=_as_hashable(shadow_max_lvl),
        clear_threshold=_as_hashable(clear_threshold),
        const_scale=bool(const_scale), decay_factor=_as_hashable(decay_factor),
        locality_degree=_as_hashable(locality_degree),
        channel_offset=int(channel_offset),
        channel_magnitude_shift=float(channel_magnitude_shift),
        blur_scaling=float(blur_scaling), cloud_color=bool(cloud_color),
        return_cloud=bool(return_cloud))


# ----------------------------- module wrapper -------------------------------

class CloudGeneratorPallas:
    """JAX/Pallas equivalent of CloudGenerator (forward pass)."""

    def __init__(self, config, cloud_p=1.0, shadow_p=1.0, seed=0):
        self.cloud_p = cloud_p
        self.shadow_p = shadow_p
        self.config = [config] if isinstance(config, dict) else config
        self._rng = random.Random(seed)   # deterministic host-side choices

    def choose_config(self):
        return self._rng.choice(self.config)

    def __call__(self, key, img, return_cloud=False, **kwargs):
        used_config = dict(self.choose_config())
        do_cloud = self._rng.random() <= self.cloud_p
        do_shadow = self._rng.random() <= self.shadow_p
        if do_shadow and do_cloud:
            out = add_cloud_and_shadow_pallas(key, img, return_cloud=return_cloud,
                                              **kwargs, **used_config)
            if return_cloud:
                out, cloud, shadow = out
            else:
                cloud, shadow = None, None
        elif do_cloud:
            out = add_cloud_pallas(key, img, return_cloud=return_cloud,
                                   **kwargs, **used_config)
            if return_cloud:
                out, cloud = out
                shadow = jnp.zeros_like(out)
            else:
                cloud, shadow = None, None
        else:
            out = img
            cloud, shadow = jnp.zeros_like(out), jnp.zeros_like(out)
        if return_cloud:
            return out, cloud, shadow
        return out


# ------------------------------------ main ----------------------------------

if __name__ == "__main__":
    B, C, H, W = 2, 4, 16, 16
    key = jax.random.PRNGKey(0)
    k_img, k_gen = jax.random.split(key)
    img = jax.random.uniform(k_img, (B, C, H, W), jnp.float32)

    config = dict(max_lvl=(0.95, 1.0), min_lvl=(0.0, 0.05), clear_threshold=0.0,
                  decay_factor=1, locality_degree=1, channel_offset=0,
                  channel_magnitude_shift=0.05, blur_scaling=0.0,
                  cloud_color=True)
    gen = CloudGeneratorPallas(config, cloud_p=1.0, shadow_p=1.0, seed=0)

    # Full debug path (masks materialised).
    out, cloud, shadow = gen(k_gen, img, return_cloud=True)
    out, cloud, shadow = jax.block_until_ready((out, cloud, shadow))

    assert out.shape == (B, C, H, W) and out.dtype == jnp.float32
    assert cloud.shape == (B, C, H, W) and shadow.shape == (B, C, H, W)
    assert bool(jnp.all(jnp.isfinite(out)))
    assert bool(jnp.all((cloud >= 0.0) & (cloud <= 1.0)))
    assert bool(jnp.all((shadow >= 0.0) & (shadow <= 1.0)))

    # Fast path (no mask writebacks) — separate compiled variant.
    gen2 = CloudGeneratorPallas(config, cloud_p=1.0, shadow_p=1.0, seed=0)
    out2 = jax.block_until_ready(gen2(k_gen, img, return_cloud=False))
    assert out2.shape == (B, C, H, W)
    assert bool(jnp.allclose(out2, out, atol=1e-5, rtol=1e-5))

    print("KERNEL_OK")
</pallas_src>

<mosaic_0001>
module attributes {stable_mosaic.version = 11 : i64} {
  func.func @kernel(%arg0: i32, %arg1: i32, %arg2: i32, %arg3: memref<1x1x8x128xf32, #tpu.memory_space<vmem>>, %arg4: memref<1x1x8x128xf32, #tpu.memory_space<vmem>>, %arg5: memref<1x1x8x128xf32, #tpu.memory_space<vmem>>, %arg6: memref<1x1x1x1xf32, #tpu.memory_space<vmem>>, %arg7: memref<1x1x1x1xf32, #tpu.memory_space<vmem>>, %arg8: memref<1x1x1x1xf32, #tpu.memory_space<vmem>>, %arg9: memref<1x1x1x1xf32, #tpu.memory_space<vmem>>, %arg10: memref<1x1x8x128xf32, #tpu.memory_space<vmem>>, %arg11: memref<1x1x8x128xf32, #tpu.memory_space<vmem>>, %arg12: memref<1x1x8x128xf32, #tpu.memory_space<vmem>>) attributes {dimension_semantics = [#tpu.dimension_semantics<parallel>, #tpu.dimension_semantics<parallel>, #tpu.dimension_semantics<arbitrary>], iteration_bounds = array<i64: 2, 1, 4>, scalar_prefetch = 0 : i64, scratch_operands = 0 : i64, tpu.core_type = #tpu.core_type<tc>, window_params = [{transform_indices = @transform_0, window_bounds = array<i64: 1, 1, 8, 128>}, {transform_indices = @transform_1, window_bounds = array<i64: 1, 1, 8, 128>}, {transform_indices = @transform_2, window_bounds = array<i64: 1, 1, 8, 128>}, {transform_indices = @transform_3, window_bounds = array<i64: 1, 1, 1, 1>}, {transform_indices = @transform_4, window_bounds = array<i64: 1, 1, 1, 1>}, {transform_indices = @transform_5, window_bounds = array<i64: 1, 1, 1, 1>}, {transform_indices = @transform_6, window_bounds = array<i64: 1, 1, 1, 1>}, {transform_indices = @transform_7, window_bounds = array<i64: 1, 1, 8, 128>}, {transform_indices = @transform_8, window_bounds = array<i64: 1, 1, 8, 128>}, {transform_indices = @transform_9, window_bounds = array<i64: 1, 1, 8, 128>}]} {
    %c0 = arith.constant 0 : index
    %c0_0 = arith.constant 0 : index
    %c0_1 = arith.constant 0 : index
    %c0_2 = arith.constant 0 : index
    %0 = vector.load %arg3[%c0, %c0_0, %c0_1, %c0_2] : memref<1x1x8x128xf32, #tpu.memory_space<vmem>>, vector<1x1x8x128xf32>
    %c0_3 = arith.constant 0 : index
    %c0_4 = arith.constant 0 : index
    %c0_5 = arith.constant 0 : index
    %c0_6 = arith.constant 0 : index
    %1 = vector.load %arg4[%c0_3, %c0_4, %c0_5, %c0_6] : memref<1x1x8x128xf32, #tpu.memory_space<vmem>>, vector<1x1x8x128xf32>
    %cst = arith.constant 0.000000e+00 : f32
    %cst_7 = arith.constant 1.000000e+00 : f32
    %2 = vector.broadcast %cst : f32 to vector<1x1x8x128xf32>
    %3 = arith.maximumf %2, %1 : vector<1x1x8x128xf32>
    %4 = vector.broadcast %cst_7 : f32 to vector<1x1x8x128xf32>
    %5 = arith.minimumf %4, %3 : vector<1x1x8x128xf32>
    %c0_8 = arith.constant 0 : index
    %c0_9 = arith.constant 0 : index
    %c0_10 = arith.constant 0 : index
    %c0_11 = arith.constant 0 : index
    %6 = vector.load %arg5[%c0_8, %c0_9, %c0_10, %c0_11] : memref<1x1x8x128xf32, #tpu.memory_space<vmem>>, vector<1x1x8x128xf32>
    %c0_12 = arith.constant 0 : index
    %c0_13 = arith.constant 0 : index
    %c0_14 = arith.constant 0 : index
    %c0_15 = arith.constant 0 : index
    %7 = vector.load %arg6[%c0_12, %c0_13, %c0_14, %c0_15] : memref<1x1x1x1xf32, #tpu.memory_space<vmem>>, vector<1x1x1x1xf32>
    %8 = vector.broadcast %7 : vector<1x1x1x1xf32> to vector<1x1x8x128xf32>
    %9 = arith.mulf %6, %8 : vector<1x1x8x128xf32>
    %c0_16 = arith.constant 0 : index
    %c0_17 = arith.constant 0 : index
    %c0_18 = arith.constant 0 : index
    %c0_19 = arith.constant 0 : index
    %10 = vector.load %arg7[%c0_16, %c0_17, %c0_18, %c0_19] : memref<1x1x1x1xf32, #tpu.memory_space<vmem>>, vector<1x1x1x1xf32>
    %11 = vector.broadcast %10 : vector<1x1x1x1xf32> to vector<1x1x8x128xf32>
    %12 = arith.addf %9, %11 : vector<1x1x8x128xf32>
    %cst_20 = arith.constant 0.000000e+00 : f32
    %cst_21 = arith.constant 1.000000e+00 : f32
    %13 = vector.broadcast %cst_20 : f32 to vector<1x1x8x128xf32>
    %14 = arith.maximumf %13, %12 : vector<1x1x8x128xf32>
    %15 = vector.broadcast %cst_21 : f32 to vector<1x1x8x128xf32>
    %16 = arith.minimumf %15, %14 : vector<1x1x8x128xf32>
    %c0_22 = arith.constant 0 : index
    %c0_23 = arith.constant 0 : index
    %c0_24 = arith.constant 0 : index
    %c0_25 = arith.constant 0 : index
    %17 = vector.load %arg9[%c0_22, %c0_23, %c0_24, %c0_25] : memref<1x1x1x1xf32, #tpu.memory_space<vmem>>, vector<1x1x1x1xf32>
    %c0_26 = arith.constant 0 : index
    %c0_27 = arith.constant 0 : index
    %c0_28 = arith.constant 0 : index
    %c0_29 = arith.constant 0 : index
    %18 = vector.load %arg8[%c0_26, %c0_27, %c0_28, %c0_29] : memref<1x1x1x1xf32, #tpu.memory_space<vmem>>, vector<1x1x1x1xf32>
    %19 = vector.broadcast %18 : vector<1x1x1x1xf32> to vector<1x1x8x128xf32>
    %20 = arith.mulf %19, %16 : vector<1x1x8x128xf32>
    %21 = vector.broadcast %17 : vector<1x1x1x1xf32> to vector<1x1x8x128xf32>
    %22 = arith.addf %21, %20 : vector<1x1x8x128xf32>
    %cst_30 = arith.constant 1.000000e+00 : f32
    %23 = vector.broadcast %cst_30 : f32 to vector<1x1x8x128xf32>
    %24 = arith.subf %23, %5 : vector<1x1x8x128xf32>
    %25 = arith.mulf %0, %24 : vector<1x1x8x128xf32>
    %cst_31 = arith.constant 1.000000e+00 : f32
    %26 = vector.broadcast %cst_31 : f32 to vector<1x1x8x128xf32>
    %27 = arith.subf %26, %16 : vector<1x1x8x128xf32>
    %28 = arith.mulf %25, %27 : vector<1x1x8x128xf32>
    %29 = arith.mulf %22, %16 : vector<1x1x8x128xf32>
    %30 = arith.addf %28, %29 : vector<1x1x8x128xf32>
    %c0_32 = arith.constant 0 : index
    %c0_33 = arith.constant 0 : index
    %c0_34 = arith.constant 0 : index
    %c0_35 = arith.constant 0 : index
    %31 = vector.load %arg10[%c0_32, %c0_33, %c0_34, %c0_35] : memref<1x1x8x128xf32, #tpu.memory_space<vmem>>, vector<1x1x8x128xf32>
    tpu.vector_store %arg10[%c0_32, %c0_33, %c0_34, %c0_35], %30 {strides = array<i32>} : memref<1x1x8x128xf32, #tpu.memory_space<vmem>>, vector<1x1x8x128xf32>,
    %c0_36 = arith.constant 0 : index
    %c0_37 = arith.constant 0 : index
    %c0_38 = arith.constant 0 : index
    %c0_39 = arith.constant 0 : index
    %32 = vector.load %arg11[%c0_36, %c0_37, %c0_38, %c0_39] : memref<1x1x8x128xf32, #tpu.memory_space<vmem>>, vector<1x1x8x128xf32>
    tpu.vector_store %arg11[%c0_36, %c0_37, %c0_38, %c0_39], %16 {strides = array<i32>} : memref<1x1x8x128xf32, #tpu.memory_space<vmem>>, vector<1x1x8x128xf32>,
    %c0_40 = arith.constant 0 : index
    %c0_41 = arith.constant 0 : index
    %c0_42 = arith.constant 0 : index
    %c0_43 = arith.constant 0 : index
    %33 = vector.load %arg12[%c0_40, %c0_41, %c0_42, %c0_43] : memref<1x1x8x128xf32, #tpu.memory_space<vmem>>, vector<1x1x8x128xf32>
    tpu.vector_store %arg12[%c0_40, %c0_41, %c0_42, %c0_43], %5 {strides = array<i32>} : memref<1x1x8x128xf32, #tpu.memory_space<vmem>>, vector<1x1x8x128xf32>,
    return
  }
  func.func @transform_0(%arg0: i32, %arg1: i32, %arg2: i32) -> (i32, i32, i32, i32) {
    %c0_i32 = arith.constant 0 : i32
    %c0_i32_0 = arith.constant 0 : i32
    return %arg0, %arg2, %arg1, %c0_i32 : i32, i32, i32, i32
  }
  func.func @transform_1(%arg0: i32, %arg1: i32, %arg2: i32) -> (i32, i32, i32, i32) {
    %c0_i32 = arith.constant 0 : i32
    %c0_i32_0 = arith.constant 0 : i32
    %c0_i32_1 = arith.constant 0 : i32
    return %arg0, %c0_i32, %arg1, %c0_i32_0 : i32, i32, i32, i32
  }
  func.func @transform_2(%arg0: i32, %arg1: i32, %arg2: i32) -> (i32, i32, i32, i32) {
    %c0_i32 = arith.constant 0 : i32
    %c0_i32_0 = arith.constant 0 : i32
    %c0_i32_1 = arith.constant 0 : i32
    return %arg0, %c0_i32, %arg1, %c0_i32_0 : i32, i32, i32, i32
  }
  func.func @transform_3(%arg0: i32, %arg1: i32, %arg2: i32) -> (i32, i32, i32, i32) {
    %c0_i32 = arith.constant 0 : i32
    %c0_i32_0 = arith.constant 0 : i32
    %c0_i32_1 = arith.constant 0 : i32
    return %arg0, %arg2, %c0_i32, %c0_i32_0 : i32, i32, i32, i32
  }
  func.func @transform_4(%arg0: i32, %arg1: i32, %arg2: i32) -> (i32, i32, i32, i32) {
    %c0_i32 = arith.constant 0 : i32
    %c0_i32_0 = arith.constant 0 : i32
    %c0_i32_1 = arith.constant 0 : i32
    return %arg0, %arg2, %c0_i32, %c0_i32_0 : i32, i32, i32, i32
  }
  func.func @transform_5(%arg0: i32, %arg1: i32, %arg2: i32) -> (i32, i32, i32, i32) {
    %c0_i32 = arith.constant 0 : i32
    %c0_i32_0 = arith.constant 0 : i32
    %c0_i32_1 = arith.constant 0 : i32
    return %arg0, %arg2, %c0_i32, %c0_i32_0 : i32, i32, i32, i32
  }
  func.func @transform_6(%arg0: i32, %arg1: i32, %arg2: i32) -> (i32, i32, i32, i32) {
    %c0_i32 = arith.constant 0 : i32
    %c0_i32_0 = arith.constant 0 : i32
    %c0_i32_1 = arith.constant 0 : i32
    return %arg0, %arg2, %c0_i32, %c0_i32_0 : i32, i32, i32, i32
  }
  func.func @transform_7(%arg0: i32, %arg1: i32, %arg2: i32) -> (i32, i32, i32, i32) {
    %c0_i32 = arith.constant 0 : i32
    %c0_i32_0 = arith.constant 0 : i32
    return %arg0, %arg2, %arg1, %c0_i32 : i32, i32, i32, i32
  }
  func.func @transform_8(%arg0: i32, %arg1: i32, %arg2: i32) -> (i32, i32, i32, i32) {
    %c0_i32 = arith.constant 0 : i32
    %c0_i32_0 = arith.constant 0 : i32
    return %arg0, %arg2, %arg1, %c0_i32 : i32, i32, i32, i32
  }
  func.func @transform_9(%arg0: i32, %arg1: i32, %arg2: i32) -> (i32, i32, i32, i32) {
    %c0_i32 = arith.constant 0 : i32
    %c0_i32_0 = arith.constant 0 : i32
    %c0_i32_1 = arith.constant 0 : i32
    return %arg0, %c0_i32, %arg1, %c0_i32_0 : i32, i32, i32, i32
  }
}

</mosaic_0001>

<bundles_post_ra>
// kernel: _add_cloud_and_shadow_impl.67
= control target key start
LH: loop header
LB: loop body
LE: loop exit
PB: predicated region body
PF: predicated region fallthrough
CT: control target
= control target key end

     0   :  { %s1113_s30 = smov 0   ;;  %s1115_s10 = smov 0   ;;  %s1188_s0 = inlined_call_operand.vmem [shape: f32[2,4,8,128], index: 0, kind: input, shape index: {}]   ;;  %s1189_s1 = inlined_call_operand.vmem [shape: f32[2,1,8,128], index: 1, kind: input, shape index: {}]   ;;  %s1190_s2 = inlined_call_operand.vmem [shape: f32[2,1,8,128], index: 2, kind: input, shape index: {}]   ;;  %s1191_s3 = inlined_call_operand.vmem [shape: f32[2,4,1,1], index: 3, kind: input, shape index: {}]   ;;  %s1192_s4 = inlined_call_operand.vmem [shape: f32[2,4,1,1], index: 4, kind: input, shape index: {}]   ;;  %s1193_s5 = inlined_call_operand.vmem [shape: f32[2,4,1,1], index: 5, kind: input, shape index: {}]   ;;  %s1194_s6 = inlined_call_operand.vmem [shape: f32[2,4,1,1], index: 6, kind: input, shape index: {}]   ;;  %s1195_s7 = inlined_call_operand.vmem [shape: f32[2,4,8,128], index: 7, kind: output, shape index: {0}]   ;;  %s1196_s8 = inlined_call_operand.vmem [shape: f32[2,4,8,128], index: 8, kind: output, shape index: {1}]   ;;  %s1197_s9 = inlined_call_operand.vmem [shape: f32[2,1,8,128], index: 9, kind: output, shape index: {2}]  }
   0x1   :  { %s1117_s11 = smov 0   ;;  %s1119_s12 = smov 0  }
   0x2   :  { %s1121_s13 = smov 0  }
   0x3 LB: > { %s32_s14 = sadd.s32 1, %s1052_s11  ;;  %s39_s15 = sadd.s32 1, %s1056_s12  ;;  %s1060_s13 = sphi %s1121_s13, %s20_s13   ;;  %s1056_s12 = sphi %s1119_s12, %s1201_s12   ;;  %s1052_s11 = sphi %s1117_s11, %s1200_s11   ;;  %s1048_s10 = sphi %s1115_s10, %s1199_s10   ;;  %s1044_s30 = sphi %s1113_s30, %s1198_s30  }
   0x4   : > { %p33_p0 = scmp.ge.s32.totalorder %s32_s14, 4  ;;  %p959_p1 = scmp.ge.s32.totalorder %s1060_s13, 1 }
   0x5   : > { %p415_p2 = scmp.lt.s32.totalorder %s1060_s13, 9 }
   0x6   : > { %s1203_s14 = smov (%p33_p0, %s32_s14), 0  ;;  %s1205_s15 = smov (!%p33_p0, %s39_s15), %s1056_s12 }
   0x7   : > { %p416_p3 = pnand %p959_p1, %p415_p2  ;;  %p41_p4 = scmp.ge.s32.totalorder %s1205_s15, 2 }
   0x8   : > { %p523_p5 = scmp.lt.s32.totalorder (!%p416_p3), %s1048_s10, 1  ;;  %p525_p6 = scmp.lt.s32.totalorder (!%p416_p3), %s1044_s30, 3  ;;  %v1062_v0 = vmov (!%p416_p3), 0  }
   0x9   : > { %s1207_s15 = smov (%p41_p4, %s1205_s15), 0  ;;  %419 = sbr.rel (%p416_p3) target bundleno = 168 (0xa8), region = 48 }
   0xa   : > { %1020 = vset.pattern.permute.xlu0 (!%p416_p3), %v1062_v0  ;;  %1021 = vset.pattern.permute.xlu1 (!%p416_p3), %v1062_v0 }
  0x10   : > { %s1209_s10 = smov (!%p523_p5, %s1048_s10), 1  ;;  %s1211_s30 = smov (!%p525_p6, %s1044_s30), 3 }
  0x11   : > { %s960_s16 = sshll.u32 %s1209_s10, 2  ;;  %s962_s17 = sshll.u32 %s1209_s10, 3 }
  0x12   : > { %s531_s18 = sadd.s32 %s960_s16, %s1211_s30  ;;  %s540_s21 = scalar_lea.vmem %s1189_s1, %s962_s17 }
  0x13   : > { %s554_s24 = scalar_lea.vmem %s1191_s3, %s531_s18  ;;  %s568_s27 = scalar_lea.vmem %s1193_s5, %s531_s18  ;;  %v606_v1 = vld [vmem:[%s540_s21] sm:$0xff] }
  0x14   : > { %v973_v2 = vld [vmem:[%s554_s24] ss:$0 sm:$0xff]  ;;  %s561_s10 = scalar_lea.vmem %s1192_s4, %s531_s18  ;;  %s575_s19 = scalar_lea.vmem %s1194_s6, %s531_s18  ;;  %v607_v4 = vmax.f32 %v606_v1, 0.0 }
  0x15   : > { %v975_v3 = vld [vmem:[%s568_s27] ss:$0 sm:$0xff]  ;;  %617 = vperm.xlu0 %1020, %v973_v2   ;;  %s604_s23 = scalar_lea.vmem %s1197_s9, %s962_s17  ;;  %s961_s21 = sshll.u32 %s531_s18, 3 }
  0x16   : > { %642 = vperm.xlu1 %1021, %v975_v3   ;;  %v974_v5 = vld [vmem:[%s561_s10] ss:$0 sm:$0xff]  ;;  %v608_v7 = vmin.f32 %v607_v4, 1.0  ;;  %s533_s26 = scalar_lea.vmem %s1188_s0, %s961_s21  ;;  %s547_s29 = scalar_lea.vmem %s1190_s2, %s962_s17 }
  0x17   : > { %v976_v6 = vld [vmem:[%s575_s19] ss:$0 sm:$0xff]  ;;  %s597_s30 = scalar_lea.vmem %s1196_s8, %s961_s21  ;;  %s586_s19 = scalar_lea.vmem %s1195_s7, %s961_s21 }
  0x18   : > { %664 = vst [vmem:[%s604_s23] sm:$0xff] %v608_v7  ;;  %v656_v8 = vsub.f32 1.0, %v608_v7  ;;  %v605_v9 = vld [vmem:[%s533_s26] sm:$0xff] }
  0x19   : > { %628 = vperm.xlu0 %1020, %v974_v5   ;;  %v609_v11 = vld [vmem:[%s547_s29] sm:$0xff] }
  0x1a   : > { %652 = vperm.xlu1 %1021, %v976_v6   ;;  %v657_v10 = vmul.f32 %v656_v8, %v605_v9 }
  0x94   : > { %v618_v12 = vpop.permute.xlu0 %617 }
  0x95   : > { %v620_v13 = vmul.f32 %v618_v12, %v609_v11  ;;  %v643_v16 = vpop.permute.xlu1 %642 }
  0x98   : > { %v629_v14 = vpop.permute.xlu0 %628 }
  0x99   : > { %v631_v15 = vadd.f32 %v629_v14, %v620_v13  ;;  %v653_v21 = vpop.permute.xlu1 %652 }
  0x9b   : > { %v632_v17 = vmax.f32 %v631_v15, 0.0 }
  0x9d   : > { %v633_v18 = vmin.f32 %v632_v17, 1.0 }
  0x9f   : > { %663 = vst [vmem:[%s597_s30] sm:$0xff] %v633_v18  ;;  %v645_v19 = vmul.f32 %v643_v16, %v633_v18  ;;  %v658_v20 = vsub.f32 1.0, %v633_v18 }
  0xa1   : > { %v655_v22 = vadd.f32 %v653_v21, %v645_v19  ;;  %v659_v23 = vmul.f32 %v658_v20, %v657_v10 }
  0xa3   : > { %v660_v24 = vmul.f32 %v655_v22, %v633_v18 }
  0xa5   : > { %v661_v25 = vadd.f32 %v660_v24, %v659_v23 }
  0xa7   : > { %662 = vst [vmem:[%s586_s19] sm:$0xff] %v661_v25 }
  0xa8 PF: > { %s20_s13 = sadd.s32 1, %s1060_s13   ;;  %s1198_s30 = smov %s1052_s11 }
  0xa9   : > { %p17_p7 = scmp.ge.s32.totalorder %s20_s13, 10   ;;  %s1199_s10 = smov %s1056_s12 }
  0xaa   : > { %s1200_s11 = smov %s1203_s14  ;;  %s1201_s12 = smov %s1207_s15 }
  0xab   :  { %19 = sbr.rel (!%p17_p7) target bundleno = 3 (0x3), region = 120 }

</bundles_post_ra>
